<compile_context>
chip_gen: v7x
topology: tpu7x:2x2x1
jax: 0.10.0
libtpu: 0.0.40
codegen_flags: <defaults>
</compile_context>

<pallas_src>
import functools

import jax
import jax.numpy as jnp
import numpy as np
from jax.experimental import pallas as pl
from jax.experimental.pallas import tpu as pltpu

_LANE = 128


def _round_up(a, b):
    return (a + b - 1) // b * b


def _round_down(a, b):
    return a // b * b


def _cdiv(a, b):
    return (a + b - 1) // b


def _vmem_capacity_bytes():
    """Per-generation VMEM capacity; conservative fallback if query fails."""
    try:
        cap = int(pltpu.get_tpu_info().vmem_capacity_bytes)
        if cap > 0:
            return cap
    except Exception:
        pass
    return 64 << 20  # conservative (v7x per-TensorCore VMEM)


def _vmem_limit(vmem_cap, need_bytes):
    """Scoped-VMEM limit derived from the actual blocks, capped per generation."""
    return int(min(max(need_bytes + (16 << 20), 32 << 20), (vmem_cap * 3) // 4))


# ----------------------------------------------------------------------------
# Kernels
# ----------------------------------------------------------------------------
def _pool_kernel(x_ref, sum_ref, *, hw, hw_tile, ragged):
    """Accumulate spatial sums per (batch, channel) across HW tiles."""
    t = pl.program_id(1)

    @pl.when(t == 0)
    def _():
        sum_ref[...] = jnp.zeros_like(sum_ref)

    x = x_ref[...].astype(jnp.float32)                        # (nb, C, T)
    if ragged:
        lane = jax.lax.broadcasted_iota(jnp.int32, (1, 1, hw_tile), 2) + t * hw_tile
        x = jnp.where(lane < hw, x, 0.0)
    sum_ref[...] += jnp.sum(x, axis=-1, keepdims=True)        # (nb, C, 1)


def _apply_kernel(lhs_ref, x_ref, b_ref, o_ref):
    """Folded scSE apply + final 1x1 conv.

    lhs[n] = [wsse; wf; wf ⊙ z2[n]]  (3, C);  out = r2 + r1*sigmoid(r0) + b.
    """
    r = jnp.einsum("brc,bct->brt", lhs_ref[...], x_ref[...],
                   preferred_element_type=jnp.float32)        # (nb, 3, T)
    out = r[:, 2:3, :] + r[:, 1:2, :] * jax.nn.sigmoid(r[:, 0:1, :]) + b_ref[0, 0]
    o_ref[...] = out.astype(o_ref.dtype)


def _fused_kernel(x_ref, wsqT_ref, wex_ref, wsse_wf_ref, wf_ref, b_ref, o_ref,
                  *, hw, hw_pad, ragged):
    """Single-read resident path: pool + excitation MLP + gated apply, one image."""
    x = x_ref[0].astype(jnp.float32)                          # (C, T)

    if ragged:
        lane = jax.lax.broadcasted_iota(jnp.int32, (1, hw_pad), 1)
        xm = jnp.where(lane < hw, x, 0.0)
    else:
        xm = x
    pooled = jnp.sum(xm, axis=-1, keepdims=True) * (1.0 / hw)  # (C, 1)

    # Excitation MLP on the VPU only (no transposes / 1-lane matmuls):
    #   z1 = relu(wsq @ pooled) as a (1, C2) row, z2 = sigmoid(wex @ z1) as (C, 1).
    z1 = jnp.maximum(jnp.sum(wsqT_ref[...] * pooled, axis=0, keepdims=True), 0.0)
    z2 = jax.nn.sigmoid(jnp.sum(wex_ref[...] * z1, axis=1, keepdims=True))

    # Heavy part: two small-M MXU matmuls streaming the resident x tile.
    r01 = jnp.dot(wsse_wf_ref[...], x, preferred_element_type=jnp.float32)   # (2, T)
    r2 = jnp.dot(wf_ref[...], z2 * x, preferred_element_type=jnp.float32)    # (1, T)
    out = r2 + r01[1:2, :] * jax.nn.sigmoid(r01[0:1, :]) + b_ref[0, 0]
    o_ref[0] = out.astype(o_ref.dtype)


# ----------------------------------------------------------------------------
# Wrapper
# ----------------------------------------------------------------------------
def scse_forward(x, wsq, wex, wsse, wf, bf, *,
                 block_target_bytes=None,
                 resident_min_bytes=None,
                 resident_max_bytes=None):
    """x: (N, C, H, W) NCHW like the PyTorch module. Returns (N, 1, H, W)."""
    N, C, H, W = x.shape
    HW = H * W
    dtype = x.dtype
    isz = jnp.dtype(dtype).itemsize
    C2 = wsq.shape[0]

    vmem_cap = _vmem_capacity_bytes()
    if block_target_bytes is None:
        # ~8 MiB x-blocks on v7x (64 MiB VMEM), ~16 MiB on v5e/v6e (128 MiB).
        block_target_bytes = max(2 << 20, min(16 << 20, vmem_cap // 8))
    if resident_min_bytes is None:
        resident_min_bytes = 1 << 20          # amortize ~0.35 us grid-step overhead
    if resident_max_bytes is None:
        resident_max_bytes = vmem_cap // 10   # leave room for temps + double buffer

    xf = x.reshape(N, C, HW)
    hw_pad = _round_up(HW, _LANE)
    img_bytes = C * hw_pad * isz
    img_bytes_f32 = C * hw_pad * 4

    wsse_f = wsse.astype(jnp.float32).reshape(1, C)
    wf_f = wf.astype(jnp.float32).reshape(1, C)
    wsq_f = wsq.astype(jnp.float32)           # (C2, C)
    wex_f = wex.astype(jnp.float32)           # (C, C2)
    b2 = bf.reshape(1, 1).astype(jnp.float32)

    # ------------------- Path A: single-read resident kernel -----------------
    if resident_min_bytes <= img_bytes and img_bytes_f32 <= resident_max_bytes:
        ragged = hw_pad != HW
        kern = functools.partial(_fused_kernel, hw=HW, hw_pad=hw_pad, ragged=ragged)
        wsse_wf = jnp.concatenate([wsse_f, wf_f], axis=0)     # (2, C)
        wsqT = wsq_f.T                                        # (C, C2)
        need = 2 * img_bytes + 2 * img_bytes_f32 + 2 * hw_pad * max(isz, 4) + (1 << 20)
        out = pl.pallas_call(
            kern,
            out_shape=jax.ShapeDtypeStruct((N, 1, HW), dtype),
            grid_spec=pltpu.PrefetchScalarGridSpec(
                num_scalar_prefetch=0,
                grid=(N,),
                in_specs=[
                    pl.BlockSpec((1, C, hw_pad), lambda n: (n, 0, 0)),   # x[n]
                    pl.BlockSpec((C, C2), lambda n: (0, 0)),             # wsqᵀ
                    pl.BlockSpec((C, C2), lambda n: (0, 0)),             # wex
                    pl.BlockSpec((2, C), lambda n: (0, 0)),              # [wsse; wf]
                    pl.BlockSpec((1, C), lambda n: (0, 0)),              # wf row
                    pl.BlockSpec(memory_space=pltpu.MemorySpace.SMEM),   # bias scalar
                ],
                out_specs=pl.BlockSpec((1, 1, hw_pad), lambda n: (n, 0, 0)),
            ),
            compiler_params=pltpu.CompilerParams(
                dimension_semantics=("parallel",),
                vmem_limit_bytes=_vmem_limit(vmem_cap, need),
            ),
        )(xf, wsqT, wex_f, wsse_wf, wf_f, b2)
        return out.reshape(N, 1, H, W)

    # ------------------- Path B: two streaming passes ------------------------
    # Spatial tile size from the bytes target; fold batch rows for tiny images.
    hw_tile = min(hw_pad,
                  max(_LANE, _round_down(block_target_bytes // max(C * isz, 1), _LANE)))
    if hw_tile >= hw_pad:
        hw_tile = hw_pad
        nb = max(1, min(N, block_target_bytes // max(C * hw_tile * isz, 1)))
    else:
        nb = 1
    n_tiles = _cdiv(HW, hw_tile)
    G = _cdiv(N, nb)
    ragged = n_tiles * hw_tile != HW

    x_blk = nb * C * hw_tile * isz

    # pass 1: spatial sums (adaptive avg-pool numerator)
    pool = functools.partial(_pool_kernel, hw=HW, hw_tile=hw_tile, ragged=ragged)
    sums = pl.pallas_call(
        pool,
        out_shape=jax.ShapeDtypeStruct((N, C, 1), jnp.float32),
        grid_spec=pltpu.PrefetchScalarGridSpec(
            num_scalar_prefetch=0,
            grid=(G, n_tiles),
            in_specs=[pl.BlockSpec((nb, C, hw_tile), lambda g, t: (g, 0, t))],
            out_specs=pl.BlockSpec((nb, C, 1), lambda g, t: (g, 0, 0)),
        ),
        compiler_params=pltpu.CompilerParams(
            dimension_semantics=("parallel", "arbitrary"),
            vmem_limit_bytes=_vmem_limit(vmem_cap, 2 * x_blk + nb * C * hw_tile * 4),
        ),
    )(xf)

    # tiny per-batch excitation MLP + algebraic fold (O(N*C), plain XLA)
    pooled = sums[:, :, 0] * (1.0 / HW)                        # (N, C), true HW
    z1 = jax.nn.relu(pooled @ wsq_f.T)                         # (N, C2)
    z2 = jax.nn.sigmoid(z1 @ wex_f.T)                          # (N, C)
    lhs = jnp.stack(
        [jnp.broadcast_to(wsse_f, (N, C)),                     # row 0: wsse
         jnp.broadcast_to(wf_f, (N, C)),                       # row 1: wf
         wf_f * z2],                                           # row 2: wf ⊙ z2
        axis=1,
    )                                                          # (N, 3, C), kept f32

    # pass 2: fused gated apply + final 1x1 conv
    need2 = (2 * x_blk + 2 * nb * hw_tile * isz
             + nb * C * hw_tile * 4 + nb * 3 * hw_tile * 4 + nb * 3 * C * 4)
    out = pl.pallas_call(
        _apply_kernel,
        out_shape=jax.ShapeDtypeStruct((N, 1, HW), dtype),
        grid_spec=pltpu.PrefetchScalarGridSpec(
            num_scalar_prefetch=0,
            grid=(G, n_tiles),
            in_specs=[
                pl.BlockSpec((nb, 3, C), lambda g, t: (g, 0, 0)),          # folded LHS
                pl.BlockSpec((nb, C, hw_tile), lambda g, t: (g, 0, t)),    # x tile
                pl.BlockSpec(memory_space=pltpu.MemorySpace.SMEM),         # bias scalar
            ],
            out_specs=pl.BlockSpec((nb, 1, hw_tile), lambda g, t: (g, 0, t)),
        ),
        compiler_params=pltpu.CompilerParams(
            dimension_semantics=("parallel", "parallel"),
            vmem_limit_bytes=_vmem_limit(vmem_cap, need2),
        ),
    )(lhs, xf, b2)
    return out.reshape(N, 1, H, W)


# ----------------------------------------------------------------------------
# Pure-JAX reference (mirrors the PyTorch scSE forward exactly)
# ----------------------------------------------------------------------------
def scse_ref(x, wsq, wex, wsse, wf, bf):
    pooled = jnp.mean(x, axis=(2, 3), keepdims=True)                    # (N,C,1,1)
    z1 = jax.nn.relu(jnp.einsum("oc,nchw->nohw", wsq, pooled))          # (N,C/2,1,1)
    z2 = jax.nn.sigmoid(jnp.einsum("oc,nchw->nohw", wex, z1))           # (N,C,1,1)
    c_out = x * z2
    q = jax.nn.sigmoid(jnp.einsum("oc,nchw->nohw", wsse, x))            # (N,1,H,W)
    s_out = x * q
    return jnp.einsum("oc,nchw->nohw", wf, c_out + s_out) + bf.reshape(1, 1, 1, 1)


def _make_inputs(key, N, C, H, W):
    C2 = max(C // 2, 1)
    ks = jax.random.split(key, 6)
    x = jax.random.normal(ks[0], (N, C, H, W), dtype=jnp.float32)
    wsq = jax.random.normal(ks[1], (C2, C), jnp.float32) / np.sqrt(C)
    wex = jax.random.normal(ks[2], (C, C2), jnp.float32) / np.sqrt(C2)
    wsse = jax.random.normal(ks[3], (1, C), jnp.float32) / np.sqrt(C)
    wf = jax.random.normal(ks[4], (1, C), jnp.float32) / np.sqrt(C)
    bfv = jax.random.normal(ks[5], (1,), jnp.float32) * 0.1
    return x, wsq, wex, wsse, wf, bfv


if __name__ == "__main__":
    key = jax.random.PRNGKey(0)
    k1, k2, k3 = jax.random.split(key, 3)

    # 1) required small shape -> two-pass path with batch folding (nb=2).
    args = _make_inputs(k1, 2, 4, 16, 16)
    out = jax.block_until_ready(scse_forward(*args))
    assert out.shape == (2, 1, 16, 16)
    np.testing.assert_allclose(np.asarray(out), np.asarray(scse_ref(*args)),
                               rtol=1e-4, atol=1e-5)

    # 2) single-read resident (fused) path with a ragged spatial tile
    #    (HW=2500 -> block width 2560; resident threshold lowered to force it).
    args = _make_inputs(k2, 2, 8, 50, 50)
    out = jax.block_until_ready(scse_forward(*args, resident_min_bytes=0))
    np.testing.assert_allclose(np.asarray(out), np.asarray(scse_ref(*args)),
                               rtol=1e-4, atol=1e-5)

    # 3) two-pass path with multiple ragged spatial tiles (forced small tiles).
    args = _make_inputs(k3, 1, 8, 72, 72)
    out = jax.block_until_ready(scse_forward(
        *args, block_target_bytes=64 * 1024, resident_max_bytes=0))
    np.testing.assert_allclose(np.asarray(out), np.asarray(scse_ref(*args)),
                               rtol=1e-4, atol=1e-5)

    print("KERNEL_OK")
</pallas_src>

<mosaic_0001>
module attributes {stable_mosaic.version = 11 : i64} {
  func.func @_pool_kernel(%arg0: i32, %arg1: i32, %arg2: memref<2x4x256xf32, #tpu.memory_space<vmem>>, %arg3: memref<2x4x1xf32, #tpu.memory_space<vmem>>) attributes {dimension_semantics = [#tpu.dimension_semantics<parallel>, #tpu.dimension_semantics<arbitrary>], iteration_bounds = array<i64: 1, 1>, scalar_prefetch = 0 : i64, scratch_operands = 0 : i64, tpu.core_type = #tpu.core_type<tc>, window_params = [{transform_indices = @transform_0, window_bounds = array<i64: 2, 4, 256>}, {transform_indices = @transform_1, window_bounds = array<i64: 2, 4, 1>}]} {
    %c0_i32 = arith.constant 0 : i32
    %0 = arith.cmpi eq, %arg1, %c0_i32 : i32
    %1 = arith.extui %0 : i1 to i32
    %c0_i32_0 = arith.constant 0 : i32
    %2 = arith.cmpi ne, %1, %c0_i32_0 : i32
    scf.if %2 {
      %cst_9 = arith.constant 0.000000e+00 : f32
      %9 = vector.broadcast %cst_9 : f32 to vector<2x4x1xf32>
      %c0_10 = arith.constant 0 : index
      %c0_11 = arith.constant 0 : index
      %c0_12 = arith.constant 0 : index
      %10 = vector.load %arg3[%c0_10, %c0_11, %c0_12] : memref<2x4x1xf32, #tpu.memory_space<vmem>>, vector<2x4x1xf32>
      tpu.vector_store %arg3[%c0_10, %c0_11, %c0_12], %9 {strides = array<i32>} : memref<2x4x1xf32, #tpu.memory_space<vmem>>, vector<2x4x1xf32>,
    } else {
    }
    %c0 = arith.constant 0 : index
    %c0_1 = arith.constant 0 : index
    %c0_2 = arith.constant 0 : index
    %3 = vector.load %arg2[%c0, %c0_1, %c0_2] : memref<2x4x256xf32, #tpu.memory_space<vmem>>, vector<2x4x256xf32>
    %c0_3 = arith.constant 0 : index
    %c0_4 = arith.constant 0 : index
    %c0_5 = arith.constant 0 : index
    %4 = vector.load %arg3[%c0_3, %c0_4, %c0_5] : memref<2x4x1xf32, #tpu.memory_space<vmem>>, vector<2x4x1xf32>
    %cst = arith.constant dense<0.000000e+00> : vector<2x4xf32>
    %5 = vector.multi_reduction <add>, %3, %cst [2] : vector<2x4x256xf32> to vector<2x4xf32>
    %6 = vector.shape_cast %5 : vector<2x4xf32> to vector<2x4x1xf32>
    %7 = arith.addf %4, %6 : vector<2x4x1xf32>
    %c0_6 = arith.constant 0 : index
    %c0_7 = arith.constant 0 : index
    %c0_8 = arith.constant 0 : index
    %8 = vector.load %arg3[%c0_6, %c0_7, %c0_8] : memref<2x4x1xf32, #tpu.memory_space<vmem>>, vector<2x4x1xf32>
    tpu.vector_store %arg3[%c0_6, %c0_7, %c0_8], %7 {strides = array<i32>} : memref<2x4x1xf32, #tpu.memory_space<vmem>>, vector<2x4x1xf32>,
    return
  }
  func.func @transform_0(%arg0: i32, %arg1: i32) -> (i32, i32, i32) {
    %c0_i32 = arith.constant 0 : i32
    %c0_i32_0 = arith.constant 0 : i32
    return %arg0, %c0_i32, %arg1 : i32, i32, i32
  }
  func.func @transform_1(%arg0: i32, %arg1: i32) -> (i32, i32, i32) {
    %c0_i32 = arith.constant 0 : i32
    %c0_i32_0 = arith.constant 0 : i32
    %c0_i32_1 = arith.constant 0 : i32
    return %arg0, %c0_i32, %c0_i32_0 : i32, i32, i32
  }
}

</mosaic_0001>

<bundles_post_ra>
// kernel: tpu_custom_call.1
= control target key start
LH: loop header
LB: loop body
LE: loop exit
PB: predicated region body
PF: predicated region fallthrough
CT: control target
= control target key end

     0   :  { %6 = vsyncpa [#allocation3], 0  ;;  %s90_s6 = smov [#allocation2]   ;;  %s138_s0 = inlined_call_operand.hbm [shape: f32[2,4,256], index: 0, kind: input, shape index: {}]   ;;  %s139_s1 = inlined_call_operand.vmem [shape: f32[2,4,1], index: 1, kind: output, shape index: {}]  }
   0x1   :  { %s12_s7 = sshll.u32 %s90_s6, 4  ;;  %s66_s10 = scalar_lea.hbm %s138_s0, 256  ;;  %s13_s7 = int_to_ptr.vmem [resolvable:$true] %s12_s7 }
   0x2   :  { %p67_p0 = scmp.ne.s32.totalorder %s138_s0, %s66_s10  ;;  %p70_p1 = scmp.lt.u32.totalorder %s66_s10, %s138_s0 }
   0x4   :  { %p72_p2 = pnand %p70_p1, %p67_p0 }
   0x6   :  { %75 = shalt.err (!%p72_p2)
}
   0x7   :  { %s76_s15 = scalar_lea.vmem %s13_s7, 256  ;;  %p81_p4 = scmp.lt.s32.totalorder %s13_s7, %s13_s7 }
   0x8   :  { %p77_p3 = scmp.ne.s32.totalorder %s13_s7, %s76_s15  ;;  %p82_p5 = scmp.lt.s32.totalorder %s76_s15, %s76_s15 }
   0xa   :  { %p83_p6 = por %p82_p5, %p81_p4 }
   0xc   :  { %p84_p7 = pnand %p83_p6, %p77_p3 }
   0xe   :  { %87 = shalt.err (!%p84_p7)
}
   0xf   :  { %s91_s16 = smov 128   ;;  %s92_s17 = smov 8  }
  0x10   :  { %18 = dma.hbm_to_vmem [thread:$0]  %s138_s0, 256, %s13_s7, [#allocation3], %s91_s16, %s91_s16, %s92_s17  }
  0x11   :  { %88 = dma.done.wait [#allocation3], 256  }
  0x12   :  { %89 = vsyncadd [#allocation3], 4294967040  ;;  %vm26_vm0 = vcmask 3072   ;;  %v93_v0 = vmov 0.0   ;;  %vm39_vm1 = vcmask 1043456   ;;  %v29_v1 = vld [vmem:[#allocation2] sm:$0xff] }
  0x13   :  { %27 = vst.msk [vmem:[%s139_s1] sm:$0xf] %vm26_vm0, %v93_v0  ;;  %28 = vst.msk [vmem:[%s139_s1 + $0x4] sm:$0xf] %vm26_vm0, %v93_v0  ;;  %v30_v2 = vld [vmem:[#allocation2 + $0x8] sm:$0xff]  ;;  %v35_v3 = vcombine.high %v29_v1, %v29_v1  ;;  %v40_v4 = vsel %vm39_vm1, %v29_v1, 0.0 }
  0x14   :  { %v36_v5 = vcombine.high %v30_v2, %v30_v2  ;;  %v45_v7 = vsel %vm39_vm1, %v30_v2, 0.0 }
  0x15   :  { %v41_v6 = vsel %vm39_vm1, %v35_v3, 0.0 }
  0x16   :  { %v46_v8 = vsel %vm39_vm1, %v36_v5, 0.0  ;;  %v42_v9 = vadd.f32 %v41_v6, %v40_v4 }
  0x17   :  { %v47_v10 = vadd.f32 %v46_v8, %v45_v7 }
  0x18   :  { %43 = vadd.xlane.f32.xlu0 %v42_v9 }
  0x1a   :  { %v31_v11 = vld [vmem:[%s139_s1] sm:$0xf]  ;;  %v32_v14 = vld [vmem:[%s139_s1 + $0x4] sm:$0xf] }
  0x1c   :  { %48 = vadd.xlane.f32.xlu0 %v47_v10 }
  0xa5   :  { %v44_v12 = vpop.xlane.xlu0 %43 }
  0xa6   :  { %v50_v13 = vadd.f32 %v44_v12, %v31_v11 }
  0xa8   :  { %53 = vst.msk [vmem:[%s139_s1] sm:$0xf] %vm26_vm0, %v50_v13 }
  0xa9   :  { %v49_v15 = vpop.xlane.xlu0 %48 }
  0xaa   :  { %v51_v16 = vadd.f32 %v49_v15, %v32_v14 }
  0xac   :  { %54 = vst.msk [vmem:[%s139_s1 + $0x4] sm:$0xf] %vm26_vm0, %v51_v16 }
  0xad   :  { %59 = vsyncpa [#allocation3], 1 }

</bundles_post_ra>
